<compile_context>
chip_gen: v7x
topology: tpu7x:2x2x1
jax: 0.10.0
libtpu: 0.0.40
codegen_flags: <defaults>
</compile_context>

<pallas_src>
import jax
import jax.numpy as jnp
from jax.experimental import pallas as pl
from jax.experimental.pallas import tpu as pltpu

# Small synthetic config consistent with the module's __init__.
D_MODEL = 32
SEQ_LEN = 8
NUM_HEADS = 4
BATCH = 2
HEAD_DIM = D_MODEL // NUM_HEADS
GRP = 3 * HEAD_DIM                     # per-head [q|k|v] lane-group width in fused proj
SCALE = HEAD_DIM ** (-0.5)
LN_EPS = 1e-5
HIGHEST = jax.lax.Precision.HIGHEST    # explicit per-op precision (no global config)

# Static layout assumptions -- fail loudly on config changes (review request).
assert D_MODEL % NUM_HEADS == 0, "head_dim must be integral"
assert D_MODEL % HEAD_DIM == 0, "output rows must decompose into whole HD-wide chunks"
assert (SEQ_LEN * HEAD_DIM) % D_MODEL == 0, "buggy-reshape row mapping assumption"


def mhca_kernel(inp_ref, w_ref, b_ref, g_ref, beta_ref, o_ref, flat_ref):
    """One batch element per grid step.

    inp_ref  : (L, 2D)    lanes 0:D = y (query side / residual), D:2D = x (kv side)
    w_ref    : (2D, 4D)   block-diag fused projection weight, per-head-interleaved cols
    b_ref    : (1, 4D)    matching bias (lanes 3D:4D are zero padding)
    g_ref    : (1, D)     LayerNorm gamma
    beta_ref : (1, D)     LayerNorm beta
    o_ref    : (L, D)     output tile for this batch element
    flat_ref : (H*L, HD)  VMEM scratch = the (H, L, HD) attention output in row-major
                          order (exactly what torch's buggy reshape flattens)
    """
    # ---- 1. Block-diagonal fused projection: one lane-dense MXU push ---------------
    proj = jnp.dot(inp_ref[...], w_ref[...],
                   precision=HIGHEST,
                   preferred_element_type=jnp.float32) + b_ref[...]       # (L, 4D)

    # ---- 2. Head split: one stack of per-head [q_h | k_h | v_h] lane groups --------
    qkv = jnp.stack([proj[:, h * GRP:(h + 1) * GRP] for h in range(NUM_HEADS)],
                    axis=0)                                               # (H, L, 3*HD)
    qh = qkv[:, :, 0:HEAD_DIM]
    kh = qkv[:, :, HEAD_DIM:2 * HEAD_DIM]
    vh = qkv[:, :, 2 * HEAD_DIM:3 * HEAD_DIM]

    # ---- 3. Attention for all heads: two batched contractions + exact softmax ------
    s = jnp.einsum('hqd,hkd->hqk', qh, kh, precision=HIGHEST,
                   preferred_element_type=jnp.float32) * SCALE            # (H, L, L)
    s = s - jnp.max(s, axis=-1, keepdims=True)
    p = jnp.exp(s)
    p = p / jnp.sum(p, axis=-1, keepdims=True)        # exact divide (numerical parity)
    o = jnp.einsum('hqk,hkd->hqd', p, vh, precision=HIGHEST,
                   preferred_element_type=jnp.float32)                    # (H, L, HD)

    # ---- 4. torch's buggy (H,L,HD).reshape(L,D): ONE relayout through scratch ------
    # merged[l, j*HD:(j+1)*HD] == flat_row[NUM_HEADS*l + j], so 4 contiguous stores +
    # NUM_HEADS stride-NUM_HEADS sublane reads + 1 lane concat reproduce it exactly
    # (replaces the previous ~80 one-row slices/concats).
    for h in range(NUM_HEADS):
        flat_ref[h * SEQ_LEN:(h + 1) * SEQ_LEN, :] = o[h]
    attn = jnp.concatenate(
        [flat_ref[pl.ds(j, SEQ_LEN, stride=NUM_HEADS), :] for j in range(NUM_HEADS)],
        axis=1)                                                           # (L, D)

    # ---- 5. dropout = eval-mode no-op; residual + LayerNorm; store ------------------
    z = attn + inp_ref[:, 0:D_MODEL]              # residual = y (lanes 0:D of the LHS)
    mu = jnp.mean(z, axis=-1, keepdims=True)
    var = jnp.mean(jnp.square(z - mu), axis=-1, keepdims=True)
    o_ref[...] = (z - mu) * jax.lax.rsqrt(var + LN_EPS) * g_ref[...] + beta_ref[...]


def _build_fused_weights(wq, bq, wkv, bkv):
    """Block-diagonal, per-head-interleaved, 128-lane-padded projection weight/bias.

    Rows 0:D apply to the y half of the LHS, rows D:2D to the x half.  Columns for
    head h are the 24-lane group [q_h | k_h | v_h]; columns 3D:4D are zero padding so
    the MXU result is a full lane-dense slab.  torch's kv_layer packs head h's output
    features as rows [2*HD*h : 2*HD*h+HD] (k) and the following HD rows (v).
    """
    d, hd = D_MODEL, HEAD_DIM
    w_bd = jnp.zeros((2 * d, 4 * d), jnp.float32)
    b_bd = jnp.zeros((1, 4 * d), jnp.float32)
    for h in range(NUM_HEADS):
        c = h * GRP
        kr = 2 * hd * h
        # q_h  <- y rows
        w_bd = w_bd.at[:d, c:c + hd].set(wq[h * hd:(h + 1) * hd, :].T)
        b_bd = b_bd.at[0, c:c + hd].set(bq[h * hd:(h + 1) * hd])
        # k_h  <- x rows
        w_bd = w_bd.at[d:, c + hd:c + 2 * hd].set(wkv[kr:kr + hd, :].T)
        b_bd = b_bd.at[0, c + hd:c + 2 * hd].set(bkv[kr:kr + hd])
        # v_h  <- x rows
        w_bd = w_bd.at[d:, c + 2 * hd:c + 3 * hd].set(wkv[kr + hd:kr + 2 * hd, :].T)
        b_bd = b_bd.at[0, c + 2 * hd:c + 3 * hd].set(bkv[kr + hd:kr + 2 * hd])
    return w_bd, b_bd


def mhca_forward(x, y, wq, bq, wkv, bkv, gamma, beta):
    """x, y: (B, L, D). Weights in torch nn.Linear layout (out_features, in_features)."""
    b, l, d = x.shape
    w_bd, b_bd = _build_fused_weights(wq, bq, wkv, bkv)
    inp = jnp.concatenate([y, x], axis=-1)                                # (B, L, 2D)

    return pl.pallas_call(
        mhca_kernel,
        out_shape=jax.ShapeDtypeStruct((b, l, d), jnp.float32),
        grid=(b,),
        in_specs=[
            pl.BlockSpec((None, l, 2 * d), lambda i: (i, 0, 0)),   # per-batch [y|x]
            pl.BlockSpec((2 * d, 4 * d), lambda i: (0, 0)),        # fused weight (resident)
            pl.BlockSpec((1, 4 * d), lambda i: (0, 0)),            # fused bias
            pl.BlockSpec((1, d), lambda i: (0, 0)),                # LN gamma
            pl.BlockSpec((1, d), lambda i: (0, 0)),                # LN beta
        ],
        out_specs=pl.BlockSpec((None, l, d), lambda i: (i, 0, 0)),
        scratch_shapes=[pltpu.VMEM((NUM_HEADS * l, HEAD_DIM), jnp.float32)],
        compiler_params=pltpu.CompilerParams(
            dimension_semantics=("parallel",)),    # v7x: batch elements on both TCs
    )(inp, w_bd, b_bd, gamma[None, :], beta[None, :])


def reference(x, y, wq, bq, wkv, bkv, gamma, beta):
    """Pure-JAX transcription of the PyTorch forward (eval mode), explicit precision."""
    b, l, d = x.shape
    hd = d // NUM_HEADS
    res = y
    q_ = jnp.einsum('bld,od->blo', y, wq, precision=HIGHEST) + bq
    kv_ = jnp.einsum('bld,od->blo', x, wkv, precision=HIGHEST) + bkv
    q_ = q_.reshape(b, l, NUM_HEADS, hd).transpose(0, 2, 1, 3)
    kv_ = kv_.reshape(b, l, NUM_HEADS, 2 * hd).transpose(0, 2, 1, 3)
    k, v = kv_[..., :hd], kv_[..., hd:]
    s = jnp.einsum('bhqd,bhkd->bhqk', q_, k, precision=HIGHEST) * SCALE
    p = jax.nn.softmax(s, axis=-1)
    o = jnp.einsum('bhqk,bhkd->bhqd', p, v, precision=HIGHEST)
    o = o.reshape(b, l, d)          # same (buggy) reshape as the module
    o = o + res
    mu = o.mean(-1, keepdims=True)
    var = ((o - mu) ** 2).mean(-1, keepdims=True)
    return (o - mu) / jnp.sqrt(var + LN_EPS) * gamma + beta


if __name__ == "__main__":
    key = jax.random.PRNGKey(0)
    k_wq, k_bq, k_wkv, k_bkv, k_x, k_y = jax.random.split(key, 6)

    # Deterministic nn.Linear-style init: U(-1/sqrt(fan_in), 1/sqrt(fan_in)).
    bound = 1.0 / (D_MODEL ** 0.5)
    wq = jax.random.uniform(k_wq, (D_MODEL, D_MODEL), jnp.float32, -bound, bound)
    bq = jax.random.uniform(k_bq, (D_MODEL,), jnp.float32, -bound, bound)
    wkv = jax.random.uniform(k_wkv, (2 * D_MODEL, D_MODEL), jnp.float32, -bound, bound)
    bkv = jax.random.uniform(k_bkv, (2 * D_MODEL,), jnp.float32, -bound, bound)
    gamma = jnp.ones((D_MODEL,), jnp.float32)   # LayerNorm weight
    beta = jnp.zeros((D_MODEL,), jnp.float32)   # LayerNorm bias

    x = jax.random.normal(k_x, (BATCH, SEQ_LEN, D_MODEL), jnp.float32)
    y = jax.random.normal(k_y, (BATCH, SEQ_LEN, D_MODEL), jnp.float32)

    out = jax.block_until_ready(mhca_forward(x, y, wq, bq, wkv, bkv, gamma, beta))

    ref = reference(x, y, wq, bq, wkv, bkv, gamma, beta)
    assert out.shape == (BATCH, SEQ_LEN, D_MODEL)
    err = float(jnp.max(jnp.abs(out - ref)))
    assert jnp.allclose(out, ref, atol=2e-4, rtol=2e-4), err
    print("KERNEL_OK")
</pallas_src>

<mosaic_0001>
module attributes {stable_mosaic.version = 11 : i64} {
  func.func @mhca_kernel(%arg0: i32, %arg1: memref<1x8x64xf32, #tpu.memory_space<vmem>>, %arg2: memref<64x128xf32, #tpu.memory_space<vmem>>, %arg3: memref<1x128xf32, #tpu.memory_space<vmem>>, %arg4: memref<1x32xf32, #tpu.memory_space<vmem>>, %arg5: memref<1x32xf32, #tpu.memory_space<vmem>>, %arg6: memref<1x8x32xf32, #tpu.memory_space<vmem>>, %arg7: memref<32x8xf32, #tpu.memory_space<vmem>>) attributes {dimension_semantics = [#tpu.dimension_semantics<parallel>], iteration_bounds = array<i64: 2>, scalar_prefetch = 0 : i64, scratch_operands = 1 : i64, tpu.core_type = #tpu.core_type<tc>, window_params = [{transform_indices = @transform_0, window_bounds = array<i64: 1, 8, 64>}, {pipeline_mode = #tpu.pipeline_mode<synchronous>, transform_indices = @transform_1, window_bounds = array<i64: 64, 128>}, {pipeline_mode = #tpu.pipeline_mode<synchronous>, transform_indices = @transform_2, window_bounds = array<i64: 1, 128>}, {pipeline_mode = #tpu.pipeline_mode<synchronous>, transform_indices = @transform_3, window_bounds = array<i64: 1, 32>}, {pipeline_mode = #tpu.pipeline_mode<synchronous>, transform_indices = @transform_4, window_bounds = array<i64: 1, 32>}, {transform_indices = @transform_5, window_bounds = array<i64: 1, 8, 32>}]} {
    %c0 = arith.constant 0 : index
    %c0_0 = arith.constant 0 : index
    %c0_1 = arith.constant 0 : index
    %0 = vector.load %arg1[%c0, %c0_0, %c0_1] : memref<1x8x64xf32, #tpu.memory_space<vmem>>, vector<1x8x64xf32>
    %1 = vector.shape_cast %0 : vector<1x8x64xf32> to vector<8x64xf32>
    %c0_2 = arith.constant 0 : index
    %c0_3 = arith.constant 0 : index
    %2 = vector.load %arg2[%c0_2, %c0_3] : memref<64x128xf32, #tpu.memory_space<vmem>>, vector<64x128xf32>
    %cst = arith.constant dense<0.000000e+00> : vector<8x128xf32>
    %3 = tpu.matmul %1, %2, %cst {dimension_numbers = #tpu.dot_dimension_numbers<[1], [0], [0], [1], [0, 0, 1, 1], [], []>, precision = #tpu.contract_precision<fp32>} : vector<8x64xf32>, vector<64x128xf32>, vector<8x128xf32> -> vector<8x128xf32>
    %c0_4 = arith.constant 0 : index
    %c0_5 = arith.constant 0 : index
    %4 = vector.load %arg3[%c0_4, %c0_5] : memref<1x128xf32, #tpu.memory_space<vmem>>, vector<1x128xf32>
    %5 = vector.broadcast %4 : vector<1x128xf32> to vector<8x128xf32>
    %6 = arith.addf %3, %5 : vector<8x128xf32>
    %7 = vector.extract_strided_slice %6 {offsets = [0, 0], sizes = [8, 24], strides = [1, 1]} : vector<8x128xf32> to vector<8x24xf32>
    %8 = vector.extract_strided_slice %6 {offsets = [0, 24], sizes = [8, 24], strides = [1, 1]} : vector<8x128xf32> to vector<8x24xf32>
    %9 = vector.extract_strided_slice %6 {offsets = [0, 48], sizes = [8, 24], strides = [1, 1]} : vector<8x128xf32> to vector<8x24xf32>
    %10 = vector.extract_strided_slice %6 {offsets = [0, 72], sizes = [8, 24], strides = [1, 1]} : vector<8x128xf32> to vector<8x24xf32>
    %11 = vector.shape_cast %7 : vector<8x24xf32> to vector<1x8x24xf32>
    %12 = vector.shape_cast %8 : vector<8x24xf32> to vector<1x8x24xf32>
    %13 = vector.shape_cast %9 : vector<8x24xf32> to vector<1x8x24xf32>
    %14 = vector.shape_cast %10 : vector<8x24xf32> to vector<1x8x24xf32>
    %15 = tpu.concatenate %11, %12, %13, %14 in 0 : vector<1x8x24xf32>, vector<1x8x24xf32>, vector<1x8x24xf32>, vector<1x8x24xf32> -> vector<4x8x24xf32>
    %16 = vector.extract_strided_slice %15 {offsets = [0, 0, 0], sizes = [4, 8, 8], strides = [1, 1, 1]} : vector<4x8x24xf32> to vector<4x8x8xf32>
    %17 = vector.extract_strided_slice %15 {offsets = [0, 0, 8], sizes = [4, 8, 8], strides = [1, 1, 1]} : vector<4x8x24xf32> to vector<4x8x8xf32>
    %18 = vector.extract_strided_slice %15 {offsets = [0, 0, 16], sizes = [4, 8, 8], strides = [1, 1, 1]} : vector<4x8x24xf32> to vector<4x8x8xf32>
    "tpu.trace_start"() <{level = 10 : i32, message = "hqd,hkd->hqk"}> : () -> ()
    %cst_6 = arith.constant dense<0.000000e+00> : vector<4x8x8xf32>
    %19 = tpu.matmul %16, %17, %cst_6 {dimension_numbers = #tpu.dot_dimension_numbers<[2], [2], [1], [1], [0, 0, 0, 1, 1, 1], [0], [0]>, precision = #tpu.contract_precision<fp32>} : vector<4x8x8xf32>, vector<4x8x8xf32>, vector<4x8x8xf32> -> vector<4x8x8xf32>
    "tpu.trace_stop"() : () -> ()
    %cst_7 = arith.constant 0.353553385 : f32
    %20 = vector.broadcast %cst_7 : f32 to vector<4x8x8xf32>
    %21 = arith.mulf %19, %20 : vector<4x8x8xf32>
    %cst_8 = arith.constant dense<0xFF800000> : vector<4x8xf32>
    %22 = vector.multi_reduction <maximumf>, %21, %cst_8 [2] : vector<4x8x8xf32> to vector<4x8xf32>
    %23 = vector.shape_cast %22 : vector<4x8xf32> to vector<4x8x1xf32>
    %24 = vector.broadcast %23 : vector<4x8x1xf32> to vector<4x8x8xf32>
    %25 = arith.subf %21, %24 : vector<4x8x8xf32>
    %26 = math.exp %25 : vector<4x8x8xf32>
    %cst_9 = arith.constant dense<0.000000e+00> : vector<4x8xf32>
    %27 = vector.multi_reduction <add>, %26, %cst_9 [2] : vector<4x8x8xf32> to vector<4x8xf32>
    %28 = vector.shape_cast %27 : vector<4x8xf32> to vector<4x8x1xf32>
    %29 = vector.broadcast %28 : vector<4x8x1xf32> to vector<4x8x8xf32>
    %30 = arith.divf %26, %29 : vector<4x8x8xf32>
    "tpu.trace_start"() <{level = 10 : i32, message = "hqk,hkd->hqd"}> : () -> ()
    %cst_10 = arith.constant dense<0.000000e+00> : vector<4x8x8xf32>
    %31 = tpu.matmul %30, %18, %cst_10 {dimension_numbers = #tpu.dot_dimension_numbers<[2], [1], [1], [2], [0, 0, 0, 1, 1, 2], [0], [0]>, precision = #tpu.contract_precision<fp32>} : vector<4x8x8xf32>, vector<4x8x8xf32>, vector<4x8x8xf32> -> vector<4x8x8xf32>
    "tpu.trace_stop"() : () -> ()
    %32 = vector.extract_strided_slice %31 {offsets = [0, 0, 0], sizes = [1, 8, 8], strides = [1, 1, 1]} : vector<4x8x8xf32> to vector<1x8x8xf32>
    %33 = vector.shape_cast %32 : vector<1x8x8xf32> to vector<8x8xf32>
    %c0_11 = arith.constant 0 : index
    %c0_12 = arith.constant 0 : index
    %34 = vector.load %arg7[%c0_11, %c0_12] : memref<32x8xf32, #tpu.memory_space<vmem>>, vector<8x8xf32>
    tpu.vector_store %arg7[%c0_11, %c0_12], %33 {strides = array<i32>} : memref<32x8xf32, #tpu.memory_space<vmem>>, vector<8x8xf32>,
    %35 = vector.extract_strided_slice %31 {offsets = [1, 0, 0], sizes = [1, 8, 8], strides = [1, 1, 1]} : vector<4x8x8xf32> to vector<1x8x8xf32>
    %36 = vector.shape_cast %35 : vector<1x8x8xf32> to vector<8x8xf32>
    %c8 = arith.constant 8 : index
    %c0_13 = arith.constant 0 : index
    %37 = vector.load %arg7[%c8, %c0_13] : memref<32x8xf32, #tpu.memory_space<vmem>>, vector<8x8xf32>
    tpu.vector_store %arg7[%c8, %c0_13], %36 {strides = array<i32>} : memref<32x8xf32, #tpu.memory_space<vmem>>, vector<8x8xf32>,
    %38 = vector.extract_strided_slice %31 {offsets = [2, 0, 0], sizes = [1, 8, 8], strides = [1, 1, 1]} : vector<4x8x8xf32> to vector<1x8x8xf32>
    %39 = vector.shape_cast %38 : vector<1x8x8xf32> to vector<8x8xf32>
    %c16 = arith.constant 16 : index
    %c0_14 = arith.constant 0 : index
    %40 = vector.load %arg7[%c16, %c0_14] : memref<32x8xf32, #tpu.memory_space<vmem>>, vector<8x8xf32>
    tpu.vector_store %arg7[%c16, %c0_14], %39 {strides = array<i32>} : memref<32x8xf32, #tpu.memory_space<vmem>>, vector<8x8xf32>,
    %41 = vector.extract_strided_slice %31 {offsets = [3, 0, 0], sizes = [1, 8, 8], strides = [1, 1, 1]} : vector<4x8x8xf32> to vector<1x8x8xf32>
    %42 = vector.shape_cast %41 : vector<1x8x8xf32> to vector<8x8xf32>
    %c24 = arith.constant 24 : index
    %c0_15 = arith.constant 0 : index
    %43 = vector.load %arg7[%c24, %c0_15] : memref<32x8xf32, #tpu.memory_space<vmem>>, vector<8x8xf32>
    tpu.vector_store %arg7[%c24, %c0_15], %42 {strides = array<i32>} : memref<32x8xf32, #tpu.memory_space<vmem>>, vector<8x8xf32>,
    %c0_16 = arith.constant 0 : index
    %c0_17 = arith.constant 0 : index
    %44 = tpu.strided_load %arg7[%c0_16, %c0_17] {strides = array<i32: 4, 1>} : memref<32x8xf32, #tpu.memory_space<vmem>>, vector<8x8xf32>
    %c1 = arith.constant 1 : index
    %c0_18 = arith.constant 0 : index
    %45 = tpu.strided_load %arg7[%c1, %c0_18] {strides = array<i32: 4, 1>} : memref<32x8xf32, #tpu.memory_space<vmem>>, vector<8x8xf32>
    %c2 = arith.constant 2 : index
    %c0_19 = arith.constant 0 : index
    %46 = tpu.strided_load %arg7[%c2, %c0_19] {strides = array<i32: 4, 1>} : memref<32x8xf32, #tpu.memory_space<vmem>>, vector<8x8xf32>
    %c3 = arith.constant 3 : index
    %c0_20 = arith.constant 0 : index
    %47 = tpu.strided_load %arg7[%c3, %c0_20] {strides = array<i32: 4, 1>} : memref<32x8xf32, #tpu.memory_space<vmem>>, vector<8x8xf32>
    %48 = tpu.concatenate %44, %45, %46, %47 in 1 : vector<8x8xf32>, vector<8x8xf32>, vector<8x8xf32>, vector<8x8xf32> -> vector<8x32xf32>
    %c0_21 = arith.constant 0 : index
    %c0_22 = arith.constant 0 : index
    %c0_23 = arith.constant 0 : index
    %49 = vector.load %arg1[%c0_21, %c0_22, %c0_23] : memref<1x8x64xf32, #tpu.memory_space<vmem>>, vector<1x8x32xf32>
    %50 = vector.shape_cast %49 : vector<1x8x32xf32> to vector<8x32xf32>
    %51 = arith.addf %48, %50 : vector<8x32xf32>
    %cst_24 = arith.constant dense<0.000000e+00> : vector<8xf32>
    %52 = vector.multi_reduction <add>, %51, %cst_24 [1] : vector<8x32xf32> to vector<8xf32>
    %53 = vector.shape_cast %52 : vector<8xf32> to vector<8x1xf32>
    %cst_25 = arith.constant 3.200000e+01 : f32
    %54 = vector.broadcast %cst_25 : f32 to vector<8x1xf32>
    %55 = arith.divf %53, %54 : vector<8x1xf32>
    %56 = vector.broadcast %55 : vector<8x1xf32> to vector<8x32xf32>
    %57 = arith.subf %51, %56 : vector<8x32xf32>
    %58 = arith.mulf %57, %57 : vector<8x32xf32>
    %cst_26 = arith.constant dense<0.000000e+00> : vector<8xf32>
    %59 = vector.multi_reduction <add>, %58, %cst_26 [1] : vector<8x32xf32> to vector<8xf32>
    %60 = vector.shape_cast %59 : vector<8xf32> to vector<8x1xf32>
    %cst_27 = arith.constant 3.200000e+01 : f32
    %61 = vector.broadcast %cst_27 : f32 to vector<8x1xf32>
    %62 = arith.divf %60, %61 : vector<8x1xf32>
    %63 = vector.broadcast %55 : vector<8x1xf32> to vector<8x32xf32>
    %64 = arith.subf %51, %63 : vector<8x32xf32>
    %cst_28 = arith.constant 9.99999974E-6 : f32
    %65 = vector.broadcast %cst_28 : f32 to vector<8x1xf32>
    %66 = arith.addf %62, %65 : vector<8x1xf32>
    %67 = math.rsqrt %66 : vector<8x1xf32>
    %68 = vector.broadcast %67 : vector<8x1xf32> to vector<8x32xf32>
    %69 = arith.mulf %64, %68 : vector<8x32xf32>
    %c0_29 = arith.constant 0 : index
    %c0_30 = arith.constant 0 : index
    %70 = vector.load %arg4[%c0_29, %c0_30] : memref<1x32xf32, #tpu.memory_space<vmem>>, vector<1x32xf32>
    %71 = vector.broadcast %70 : vector<1x32xf32> to vector<8x32xf32>
    %72 = arith.mulf %69, %71 : vector<8x32xf32>
    %c0_31 = arith.constant 0 : index
    %c0_32 = arith.constant 0 : index
    %73 = vector.load %arg5[%c0_31, %c0_32] : memref<1x32xf32, #tpu.memory_space<vmem>>, vector<1x32xf32>
    %74 = vector.broadcast %73 : vector<1x32xf32> to vector<8x32xf32>
    %75 = arith.addf %72, %74 : vector<8x32xf32>
    %c0_33 = arith.constant 0 : index
    %c0_34 = arith.constant 0 : index
    %c0_35 = arith.constant 0 : index
    %76 = vector.load %arg6[%c0_33, %c0_34, %c0_35] : memref<1x8x32xf32, #tpu.memory_space<vmem>>, vector<1x8x32xf32>
    %77 = vector.shape_cast %76 : vector<1x8x32xf32> to vector<8x32xf32>
    %78 = vector.shape_cast %75 : vector<8x32xf32> to vector<1x8x32xf32>
    tpu.vector_store %arg6[%c0_33, %c0_34, %c0_35], %78 {strides = array<i32>} : memref<1x8x32xf32, #tpu.memory_space<vmem>>, vector<1x8x32xf32>,
    return
  }
  func.func @transform_0(%arg0: i32) -> (i32, i32, i32) {
    %c0_i32 = arith.constant 0 : i32
    %c0_i32_0 = arith.constant 0 : i32
    %c0_i32_1 = arith.constant 0 : i32
    return %arg0, %c0_i32, %c0_i32_0 : i32, i32, i32
  }
  func.func @transform_1(%arg0: i32) -> (i32, i32) {
    %c0_i32 = arith.constant 0 : i32
    %c0_i32_0 = arith.constant 0 : i32
    %c0_i32_1 = arith.constant 0 : i32
    return %c0_i32, %c0_i32_0 : i32, i32
  }
  func.func @transform_2(%arg0: i32) -> (i32, i32) {
    %c0_i32 = arith.constant 0 : i32
    %c0_i32_0 = arith.constant 0 : i32
    %c0_i32_1 = arith.constant 0 : i32
    return %c0_i32, %c0_i32_0 : i32, i32
  }
  func.func @transform_3(%arg0: i32) -> (i32, i32) {
    %c0_i32 = arith.constant 0 : i32
    %c0_i32_0 = arith.constant 0 : i32
    %c0_i32_1 = arith.constant 0 : i32
    return %c0_i32, %c0_i32_0 : i32, i32
  }
  func.func @transform_4(%arg0: i32) -> (i32, i32) {
    %c0_i32 = arith.constant 0 : i32
    %c0_i32_0 = arith.constant 0 : i32
    %c0_i32_1 = arith.constant 0 : i32
    return %c0_i32, %c0_i32_0 : i32, i32
  }
  func.func @transform_5(%arg0: i32) -> (i32, i32, i32) {
    %c0_i32 = arith.constant 0 : i32
    %c0_i32_0 = arith.constant 0 : i32
    %c0_i32_1 = arith.constant 0 : i32
    return %arg0, %c0_i32, %c0_i32_0 : i32, i32, i32
  }
}

</mosaic_0001>

<bundles_post_ra>
// kernel: tpu_custom_call.1
= control target key start
LH: loop header
LB: loop body
LE: loop exit
PB: predicated region body
PF: predicated region fallthrough
CT: control target
= control target key end

     0   :  { %10 = vsyncpa [#allocation4], 0  ;;  %s6150_s0 = inlined_call_operand.hbm [shape: f32[2,8,64], index: 0, kind: input, shape index: {}]   ;;  %s6151_s1 = inlined_call_operand.hbm [shape: f32[64,128], index: 1, kind: input, shape index: {}]   ;;  %s6152_s2 = inlined_call_operand.vmem [shape: f32[1,128], index: 2, kind: input, shape index: {}]   ;;  %s6153_s3 = inlined_call_operand.vmem [shape: f32[1,32], index: 3, kind: input, shape index: {}]   ;;  %s6154_s4 = inlined_call_operand.vmem [shape: f32[1,32], index: 4, kind: input, shape index: {}]   ;;  %s6155_s5 = inlined_call_operand.hbm [shape: f32[2,8,32], index: 5, kind: output, shape index: {}]  }
   0x1   :  { %12 = vsyncpa [#allocation4 + $0x1], 0 }
   0x2   :  { %13 = vsyncpa [#allocation7], 0 }
   0x3   :  { %14 = vsyncpa [#allocation5], 0 }
   0x4   :  { %16 = vsyncpa [#allocation5 + $0x1], 0  ;;  %s5589_s18 = smov 0   ;;  %s5591_s19 = smov 0  }
   0x5   :  { %s5593_s20 = smov 0   ;;  %s5595_s21 = smov 0  }
   0x6 LB: > { %s5610_s22 = sadd.s32 4294967295, %s5541_s21   ;;  %s4640_s23 = sadd.s32 4294967294, %s5541_s21   ;;  %s5541_s21 = sphi %s5595_s21, %s6175_s21   ;;  %s5537_s20 = sphi %s5593_s20, %s6174_s20   ;;  %s5533_s19 = sphi %s5591_s19, %s6173_s19   ;;  %s5529_s18 = sphi %s5589_s18, %s6172_s18  }
   0x7   : > { %p42_p0 = scmp.ne.s32.totalorder %s5533_s19, %s5529_s18  ;;  %p6156_p1 = scmp.eq.s32.totalorder %s5610_s22, 0 }
   0x8   : > { %p156_p3 = scmp.eq.s32.totalorder %s4640_s23, 1  ;;  %p4641_p5 = scmp.ge.s32.totalorder %s5541_s21, 1 }
   0x9   : > { %p5619_p4 = por %p6156_p1, %p42_p0  ;;  %p163_p7 = scmp.lt.s32.totalorder %s5541_s21, 3 }
   0xa   : > { %p5624_p6 = por %p156_p3, %p42_p0  ;;  %s5543_s27 = smov [#allocation6]  }
   0xb   : > { %s6159_s24 = scalar_select %p5619_p4, 1, 0 }
   0xc   : > { %s6160_s25 = scalar_select %p5624_p6, 1, 0 }
   0xd   : > { %p5629_p8 = pnand %p4641_p5, %p163_p7  ;;  %s175_s28 = sshll.u32 %s5543_s27, 4  ;;  %s5633_s28 = int_to_ptr.vmem [resolvable:$true] %s175_s28 }
   0xe   : > { %s5645_s30 = sadd.s32 1, %s5541_s21   ;;  %s29_s6 = sadd.s32 1, %s5537_s20 }
   0xf   : > { %s6161_s26 = scalar_select %p5629_p8, 1, 0 }
  0x10   : > { %p5332_p9 = pneg %p5629_p8  ;;  %s26_s7 = ssub.s32 %s5541_s21, %s5645_s30 }
  0x11   : > { %s5413_s10 = scalar_lea.hbm %s6151_s1, 1024 }
  0x12   : > { %p5640_p11 = pnand %p5332_p9, %p6156_p1  ;;  %p5414_p12 = scmp.ne.s32.totalorder %s6151_s1, %s5413_s10 }
  0x13   : > { %p5420_p5 = scmp.lt.u32.totalorder %s5413_s10, %s6151_s1 }
  0x14   : > { %p5415_p13 = pneg %p5640_p11 }
  0x16   : > { %p5416_p0 = pnand %p5415_p13, %p5414_p12 }
  0x18   : > { %p5417_p3 = pneg %p5416_p0 }
  0x1a   : > { %p5422_p7 = pnand %p5420_p5, %p5417_p3 }
  0x1c   : > { %5425 = shalt.err (!%p5422_p7)
}
  0x1d   : > { %s5426_s15 = scalar_lea.vmem %s5633_s28, 1024  ;;  %p5434_p2 = scmp.lt.s32.totalorder %s5633_s28, %s5633_s28 }
  0x1e   : > { %p5427_p9 = scmp.ne.s32.totalorder %s5633_s28, %s5426_s15  ;;  %p5435_p6 = scmp.lt.s32.totalorder %s5426_s15, %s5426_s15 }
  0x20   : > { %p5429_p10 = pnand %p5427_p9, %p5415_p13  ;;  %p5436_p4 = por %p5435_p6, %p5434_p2 }
  0x22   : > { %p5430_p1 = pneg %p5429_p10 }
  0x24   : > { %p5437_p8 = pnand %p5436_p4, %p5430_p1 }
  0x26   : > { %5440 = shalt.err (!%p5437_p8)
}
  0x27   : > { %s5544_s16 = smov 128   ;;  %s5545_s17 = smov 8  }
  0x28   : > { %5335 = dma.hbm_to_vmem [thread:$0]  (!%p5640_p11), %s6151_s1, 1024, %s5633_s28, [#allocation7], %s5544_s16, %s5544_s16, %s5545_s17  }
  0x29   : > { %p27_p2 = scmp.eq.s32.totalorder %s26_s7, 0  ;;  %p36_p1 = scmp.ne.s32.totalorder %s5537_s20, %s5533_s19 }
  0x2a   : > { %p37_p4 = scmp.eq.s32.totalorder %s5541_s21, 0  ;;  %p5345_p6 = scmp.lt.s32.totalorder %s5541_s21, 2 }
  0x2b   : > { %s5676_s8 = scalar_select %p27_p2, %s5537_s20, %s29_s6  }
  0x2c   : > { %p38_p8 = por %p37_p4, %p36_p1  ;;  %p6163_p10 = scmp.eq.s32.totalorder %s5610_s22, 1 }
  0x2d   : > { %s198_s10 = sand.u32 1, %s5537_s20   ;;  %s4645_s11 = sshll.u32 %s5541_s21, 7 }
  0x2e   : > { %p5680_p12 = por %p6163_p10, %p36_p1  ;;  %s4644_s12 = sshll.u32 %s198_s10, 3 }
  0x2f   : > { %s5689_s14 = scalar_lea.hbm %s6150_s0, %s4645_s11  ;;  %s202_s28 = scalar_lea.vmem [#allocation3], %s4644_s12 }
  0x30   : > { %s209_s6 = sshll.u32 %s202_s28, 4  ;;  %p5691_p11 = pnand %p5345_p6, %p38_p8  ;;  %s5695_s6 = int_to_ptr.vmem [resolvable:$true] %s209_s6 }
  0x31   : > { %s199_s15 = scalar_lea.sflag [#allocation4], %s198_s10  ;;  %s5441_s16 = scalar_lea.hbm %s5689_s14, 128 }
  0x32   : > { %p5442_p13 = scmp.ne.s32.totalorder %s5689_s14, %s5441_s16  ;;  %p5443_p0 = pneg %p5691_p11 }
  0x33   : > { %s5446_s27 = scalar_lea.hbm %s6150_s0, 256  ;;  %p5447_p7 = scmp.lt.u32.totalorder %s5689_s14, %s6150_s0 }
  0x34   : > { %p5444_p3 = pnand %p5443_p0, %p5442_p13  ;;  %p5448_p9 = scmp.lt.u32.totalorder %s5446_s27, %s5441_s16 }
  0x35   : > { %p5450_p1 = scmp.lt.u32.totalorder %s5441_s16, %s5689_s14 }
  0x36   : > { %p5445_p5 = pneg %p5444_p3  ;;  %p5449_p2 = por %p5448_p9, %p5447_p7 }
  0x38   : > { %p5451_p4 = por %p5450_p1, %p5449_p2 }
  0x3a   : > { %p5452_p6 = pnand %p5451_p4, %p5445_p5 }
  0x3c   : > { %5455 = shalt.err (!%p5452_p6)
}
  0x3d   : > { %s5456_s10 = scalar_lea.vmem %s5695_s6, 128  ;;  %s5546_s29 = smov [#allocation3]  }
  0x3e   : > { %p5457_p8 = scmp.ne.s32.totalorder %s5695_s6, %s5456_s10  ;;  %s5461_s13 = sshll.u32 %s5546_s29, 4  ;;  %s5462_s13 = int_to_ptr.vmem [resolvable:$false] %s5461_s13 }
  0x3f   : > { %s5463_s28 = scalar_lea.vmem %s5462_s13, 256  ;;  %p5464_p3 = scmp.lt.s32.totalorder %s5695_s6, %s5462_s13 }
  0x40   : > { %p5459_p10 = pnand %p5457_p8, %p5443_p0  ;;  %p5465_p7 = scmp.lt.s32.totalorder %s5463_s28, %s5456_s10 }
  0x42   : > { %p5460_p13 = pneg %p5459_p10  ;;  %p5466_p9 = por %p5465_p7, %p5464_p3 }
  0x44   : > { %p5467_p2 = pnand %p5466_p9, %p5460_p13 }
  0x46   : > { %5470 = shalt.err (!%p5467_p2)
}
  0x47   : > { %5339 = dma.hbm_to_vmem [thread:$0]  (!%p5691_p11), %s5689_s14, 128, %s5695_s6, %s199_s15  }
  0x48   : > { %p6166_p5 = scmp.ne.s32.totalorder %s6161_s26, 0 }
  0x49   : > { %s5725_s16 = sand.u32 (!%p6166_p5), 1, %s5533_s19   ;;  %p6167_p0 = scmp.ne.s32.totalorder (!%p6166_p5), %s6159_s24, 0 }
  0x4a   : > { %218 = sbr.rel (%p6166_p5) target bundleno = 2011 (0x7db), region = 40  ;;  %s4647_s17 = sshll.u32 (!%p6166_p5), %s5725_s16, 3 }
  0x4b   : > { %s221_s23 = scalar_lea.sflag (!%p6166_p5), [#allocation4], %s5725_s16  ;;  %s5731_s27 = scalar_lea.vmem (!%p6166_p5), [#allocation3], %s4647_s17 }
  0x51   : > { %5516 = dma.done.wait (%p6167_p0), %s221_s23, 128  }
  0x52   : > { %5518 = vsyncadd (%p6167_p0), %s221_s23, 4294967168  ;;  %p6168_p11 = scmp.eq.s32.totalorder %s5610_s22, 0 }
  0x54   : > { %5520 = dma.done.wait (%p6168_p11), [#allocation7], 1024   ;;  %p6169_p1 = pmov %p6168_p11 }
  0x55   : > { %v5547_v0 = vmov 0.0|0.0   ;;  %vm5548_vm0 = vmmov 0   ;;  %v5549_v1 = vmov 0.0   ;;  %v256_v2 = vld [vmem:[#allocation6] sm:$0xff]  ;;  %v257_v3 = vld [vmem:[#allocation6 + $0x8] sm:$0xff]  ;;  %v258_v4 = vld [vmem:[#allocation6 + $0x10] sm:$0xff] }
  0x56   : > { %5522 = vsyncadd (%p6169_p1), [#allocation7], 4294966272  ;;  %5161 = vmatprep.subr.bf16.mxu0 %v5547_v0  ;;  %4823 = vmatprep.mubr.msk.f32.mxu0 %vm5548_vm0, %v5549_v1  ;;  %v276_v5 = vand.u32 4294901760, %v256_v2  ;;  %v279_v6 = vand.u32 4294901760, %v257_v3  ;;  %v259_v7 = vld [vmem:[#allocation6 + $0x18] sm:$0xff]  ;;  %v282_v8 = vand.u32 4294901760, %v258_v4 }
  0x57   : > { %4921 = vmatprep.subr.mxu1 %v5549_v1  ;;  %4923 = vmatprep.mubr.msk.f32.mxu1 %vm5548_vm0, %v5549_v1  ;;  %v260_v9 = vld [vmem:[#allocation6 + $0x20] sm:$0xff]  ;;  %v261_v10 = vld [vmem:[#allocation6 + $0x28] sm:$0xff]  ;;  %v285_v11 = vand.u32 4294901760, %v259_v7  ;;  %v255_v12 = vld [vmem:[%s5731_s27] sm:$0xff]  ;;  %vm271_vm1 = vcmask 523264   ;;  %s5550_s14 = smov 80  }
  0x58   : > { %v5748_v13 = vpack.c.bf16 %v279_v6, %v276_v5  ;;  %v5750_v14 = vsub.f32 %v256_v2, %v276_v5  ;;  %v5752_v15 = vsub.f32 %v257_v3, %v279_v6  ;;  %v5754_v16 = vsub.f32 %v258_v4, %v282_v8  ;;  %v262_v20 = vld [vmem:[#allocation6 + $0x30] sm:$0xff]  ;;  %v263_v21 = vld [vmem:[#allocation6 + $0x38] sm:$0xff]  ;;  %s5551_s6 = smov 104   ;;  %s5552_s7 = smov 120  }
  0x59   : > { %v5756_v17 = vsub.f32 %v259_v7, %v285_v11  ;;  %v288_v18 = vand.u32 4294901760, %v260_v9  ;;  %v291_v19 = vand.u32 4294901760, %v261_v10  ;;  %v5759_v22 = vpack.c.bf16 %v285_v11, %v282_v8  ;;  %v4650_v11 = vld [vmem:[%s6152_s2] ss:$0 sm:$0xff]  ;;  %s5553_s15 = smov 56   ;;  %s5554_s11 = smov 112  }
  0x5a   : > { %5163 = vmatpush3.bf16.msra.mxu0 %v5748_v13  ;;  %v273_v23 = vsel %vm271_vm1, %v255_v12, 0  ;;  %v361_v25 = vand.u32 4294901760, %v5750_v14  ;;  %v368_v26 = vand.u32 4294901760, %v5752_v15  ;;  %v294_v27 = vand.u32 4294901760, %v262_v20  ;;  %s5555_s12 = smov 16   ;;  %s5556_s10 = smov 8  }
  0x5b   : > { %5164 = vmatprep.subr.bf16.mxu0 %v5547_v0  ;;  %v5762_v24 = vand.u32 4294901760, %v273_v23  ;;  %v297_v28 = vand.u32 4294901760, %v263_v21  ;;  %v5766_v29 = vpack.c.bf16 %v291_v19, %v288_v18  ;;  %v375_v31 = vand.u32 4294901760, %v5754_v16  ;;  %s5557_s29 = smov 24   ;;  %s4654_s24 = sshll.u32 %s5610_s22, 7 }
  0x5c   : > { %v382_v32 = vand.u32 4294901760, %v5756_v17  ;;  %v5774_v33 = vsub.f32 %v260_v9, %v288_v18  ;;  %v5776_v34 = vsub.f32 %v261_v10, %v291_v19  ;;  %v362_v35 = vsub.f32 %v5750_v14, %v361_v25  ;;  %s254_s26 = scalar_lea.vmem [#allocation8], %s4647_s17  ;;  %s5558_s22 = smov [#allocation8]  }
  0x5d   : > { %v5769_v30 = vsub.f32 %v273_v23, %v5762_v24  ;;  %v369_v36 = vsub.f32 %v5752_v15, %v368_v26  ;;  %v5786_v38 = vpack.c.bf16 %v297_v28, %v294_v27  ;;  %v5788_v39 = vsub.f32 %v262_v20, %v294_v27  ;;  %s5475_s17 = sshll.u32 %s5558_s22, 4  ;;  %s5476_s17 = int_to_ptr.vmem [resolvable:$false] %s5475_s17 }
  0x5e   : > { %5166 = vmatpush3.bf16.msra.mxu0 %v5759_v22  ;;  %v5790_v40 = vsub.f32 %v263_v21, %v297_v28  ;;  %v376_v42 = vsub.f32 %v5754_v16, %v375_v31  ;;  %v383_v43 = vsub.f32 %v5756_v17, %v382_v32  ;;  %v363_v44 = vand.u32 4294901760, %v362_v35 }
  0x5f   : > { %5167 = vmatprep.subr.bf16.mxu0 %v5547_v0  ;;  %v350_v37 = vand.u32 4294901760, %v5769_v30  ;;  %v370_v45 = vand.u32 4294901760, %v369_v36  ;;  %v389_v46 = vand.u32 4294901760, %v5774_v33  ;;  %v396_v47 = vand.u32 4294901760, %v5776_v34 }
  0x60   : > { %v377_v49 = vand.u32 4294901760, %v376_v42  ;;  %v384_v50 = vand.u32 4294901760, %v383_v43  ;;  %v403_v51 = vand.u32 4294901760, %v5788_v39  ;;  %v410_v55 = vand.u32 4294901760, %v5790_v40 }
  0x61   : > { %v351_v41 = vsub.f32 %v5769_v30, %v350_v37  ;;  %v5174_v52 = vpack.c.bf16 %v370_v45, %v363_v44  ;;  %v390_v53 = vsub.f32 %v5774_v33, %v389_v46  ;;  %v397_v54 = vsub.f32 %v5776_v34, %v396_v47 }
  0x62   : > { %5169 = vmatpush3.bf16.msra.mxu0 %v5766_v29  ;;  %v404_v56 = vsub.f32 %v5788_v39, %v403_v51  ;;  %v5177_v57 = vpack.c.bf16 %v384_v50, %v377_v49  ;;  %v411_v60 = vsub.f32 %v5790_v40, %v410_v55  ;;  %v5186_v3 = vpack.c.bf16 %v5752_v15, %v5750_v14 }
  0x63   : > { %5170 = vmatprep.subr.bf16.mxu0 %v5547_v0  ;;  %v352_v48 = vand.u32 4294901760, %v351_v41  ;;  %v391_v58 = vand.u32 4294901760, %v390_v53  ;;  %v398_v59 = vand.u32 4294901760, %v397_v54  ;;  %v5189_v4 = vpack.c.bf16 %v5756_v17, %v5754_v16 }
  0x64   : > { %v405_v62 = vand.u32 4294901760, %v404_v56  ;;  %v412_v63 = vand.u32 4294901760, %v411_v60  ;;  %v5192_v5 = vpack.c.bf16 %v5776_v34, %v5774_v33  ;;  %v5195_v6 = vpack.c.bf16 %v5790_v40, %v5788_v39 }
  0x65   : > { %v5180_v61 = vpack.c.bf16 %v398_v59, %v391_v58  ;;  %v5210_v7 = vpack.c.bf16 %v368_v26, %v361_v25  ;;  %v5213_v8 = vpack.c.bf16 %v382_v32, %v375_v31  ;;  %v5216_v9 = vpack.c.bf16 %v396_v47, %v389_v46 }
  0x66   : > { %5172 = vmatpush3.bf16.msra.mxu0 %v5786_v38  ;;  %v5183_v2 = vpack.c.bf16 %v412_v63, %v405_v62  ;;  %v5219_v10 = vpack.c.bf16 %v410_v55, %v403_v51  ;;  %vm821_vm2 = vcmask 64512   ;;  %vm4508_vm3 = vcmask 130048  }
  0x67   : > { %5173 = vmatprep.subr.bf16.mxu0 %v5547_v0  ;;  %vm4510_vm4 = vcmask 195584   ;;  %vm4514_vm5 = vcmask 261120  }
  0x69   : > { %4824 = vmatmul.mubr.f32.vlgmr.msra.gmra.mrb[0].mxu0 %v352_v48 }
  0x6a   : > { %5175 = vmatpush3.bf16.msra.mxu0 %v5174_v52  ;;  %4842 = vmatprep.mubr.msk.f32.mxu0 %vm5548_vm0, %v5549_v1 }
  0x6b   : > { %5176 = vmatprep.subr.bf16.mxu0 %v5547_v0 }
  0x6e   : > { %5178 = vmatpush3.bf16.msra.mxu0 %v5177_v57 }
  0x6f   : > { %5179 = vmatprep.subr.bf16.mxu0 %v5547_v0 }
  0x72   : > { %5181 = vmatpush3.bf16.msra.mxu0 %v5180_v61 }
  0x73   : > { %5182 = vmatprep.subr.bf16.mxu0 %v5547_v0 }
  0x76   : > { %5184 = vmatpush3.bf16.msra.mxu0 %v5183_v2 }
  0x77   : > { %5185 = vmatprep.subr.bf16.mxu0 %v5547_v0 }
  0x79   : > { %4843 = vmatmul.mubr.f32.vlgmr.msra.gmra.mrb[0].mxu0 %v5762_v24 }
  0x7a   : > { %5187 = vmatpush3.bf16.msra.mxu0 %v5186_v3  ;;  %4861 = vmatprep.mubr.msk.f32.mxu0 %vm5548_vm0, %v5549_v1 }
  0x7b   : > { %5188 = vmatprep.subr.bf16.mxu0 %v5547_v0 }
  0x7e   : > { %5190 = vmatpush3.bf16.msra.mxu0 %v5189_v4 }
  0x7f   : > { %5191 = vmatprep.subr.bf16.mxu0 %v5547_v0 }
  0x82   : > { %5193 = vmatpush3.bf16.msra.mxu0 %v5192_v5 }
  0x83   : > { %5194 = vmatprep.subr.bf16.mxu0 %v5547_v0 }
  0x86   : > { %5196 = vmatpush3.bf16.msra.mxu0 %v5195_v6 }
  0x87   : > { %5197 = vmatprep.subr.bf16.mxu0 %v5547_v0 }
  0x89   : > { %4862 = vmatmul.mubr.f32.vlgmr.msra.gmra.mrb[0].mxu0 %v5769_v30 }
  0x8a   : > { %5199 = vmatpush3.bf16.msra.mxu0 %v5748_v13  ;;  %4880 = vmatprep.mubr.msk.f32.mxu0 %vm5548_vm0, %v5549_v1 }
  0x8b   : > { %5200 = vmatprep.subr.bf16.mxu0 %v5547_v0 }
  0x8e   : > { %5202 = vmatpush3.bf16.msra.mxu0 %v5759_v22 }
  0x8f   : > { %5203 = vmatprep.subr.bf16.mxu0 %v5547_v0 }
  0x92   : > { %5205 = vmatpush3.bf16.msra.mxu0 %v5766_v29 }
  0x93   : > { %5206 = vmatprep.subr.bf16.mxu0 %v5547_v0 }
  0x96   : > { %5208 = vmatpush3.bf16.msra.mxu0 %v5786_v38 }
  0x97   : > { %5209 = vmatprep.subr.bf16.mxu0 %v5547_v0 }
  0x99   : > { %4881 = vmatmul.mubr.f32.vlgmr.msra.gmra.mrb[0].mxu0 %v350_v37 }
  0x9a   : > { %5211 = vmatpush3.bf16.msra.mxu0 %v5210_v7  ;;  %4899 = vmatprep.mubr.msk.f32.mxu0 %vm5548_vm0, %v5549_v1 }
  0x9b   : > { %5212 = vmatprep.subr.bf16.mxu0 %v5547_v0 }
  0x9e   : > { %5214 = vmatpush3.bf16.msra.mxu0 %v5213_v8 }
  0x9f   : > { %5215 = vmatprep.subr.bf16.mxu0 %v5547_v0 }
  0xa2   : > { %5217 = vmatpush3.bf16.msra.mxu0 %v5216_v9 }
  0xa3   : > { %5218 = vmatprep.subr.bf16.mxu0 %v5547_v0 }
  0xa6   : > { %5220 = vmatpush3.bf16.msra.mxu0 %v5219_v10 }
  0xa7   : > { %5221 = vmatprep.subr.bf16.mxu0 %v5547_v0 }
  0xa9   : > { %4900 = vmatmul.mubr.f32.vlgmr.msra.gmra.mrb[0].mxu0 %v5762_v24 }
  0xaa   : > { %5223 = vmatpush3.bf16.msra.mxu0 %v5748_v13  ;;  %4918 = vmatprep.mubr.msk.f32.mxu0 %vm5548_vm0, %v5549_v1 }
  0xab   : > { %5224 = vmatprep.subr.bf16.mxu0 %v5547_v0 }
  0xae   : > { %5226 = vmatpush3.bf16.msra.mxu0 %v5759_v22 }
  0xaf   : > { %5227 = vmatprep.subr.bf16.mxu0 %v5547_v0 }
  0xb2   : > { %5229 = vmatpush3.bf16.msra.mxu0 %v5766_v29 }
  0xb3   : > { %5230 = vmatprep.subr.bf16.mxu0 %v5547_v0 }
  0xb6   : > { %5232 = vmatpush3.bf16.msra.mxu0 %v5786_v38 }
  0xb7   : > { %5041 = vmatprep.subr.mxu0 %v5549_v1 }
  0xb9   : > { %4919 = vmatmul.mubr.f32.vlgmr.msra.gmra.mrb[0].mxu0 %v5762_v24 }
  0xba   : > { %5043 = vmatprep.mubr.msk.f32.mxu0 %vm5548_vm0, %v5549_v1 }
 0x18c   : > { %v808_v12 = vpop.f32.mrb[0].mxu0 }
 0x18d   : > { %v5882_v13 = vadd.f32 %v4650_v11, %v808_v12  ;;  %v4920_v14 = vpop.f32.mrb[1].mxu0 }
 0x18f   : > { %815 = vrot.lane.b32.xlu1 %v5882_v13, %s5550_s14  ;;  %813 = vrot.lane.b32.xlu0 %v5882_v13, %s5551_s6  ;;  %v822_v0 = vsel %vm821_vm2, %v5882_v13, 0  ;;  %s4560_s14 = sshll.u32 %s254_s26, 4  ;;  %s6107_s14 = int_to_ptr.vmem [resolvable:$true] %s4560_s14 }
 0x190   : > { %v892_v15 = vand.u32 4294901760, %v822_v0  ;;  %p5478_p10 = scmp.lt.s32.totalorder %s6107_s14, %s5476_s17 }
 0x192   : > { %v893_v16 = vsub.f32 %v822_v0, %v892_v15 }
 0x193   : > { %819 = vrot.lane.b32.xlu0 %v5882_v13, %s5552_s7 }
 0x194   : > { %v894_v18 = vand.u32 4294901760, %v893_v16 }
 0x196   : > { %v895_v22 = vsub.f32 %v893_v16, %v894_v18 }
 0x197   : > { %817 = vrot.lane.b32.xlu0 %v5882_v13, %s5553_s15  ;;  %s6105_s15 = scalar_lea.hbm %s6155_s5, %s4654_s24 }
 0x198   : > { %v896_v26 = vand.u32 4294901760, %v895_v22 }
 0x201   : > { %v5890_v17 = vpop.permute.xlu0 %813  ;;  %v5893_v19 = vpop.permute.xlu1 %815 }
 0x202   : > { %1272 = vrot.lane.b32.xlu1 %v5890_v17, %s5552_s7  ;;  %v1274_v30 = vsel %vm821_vm2, %v5890_v17, 0  ;;  %v1726_v44 = vsel %vm821_vm2, %v5893_v19, 0 }
 0x203   : > { %v1344_v31 = vand.u32 4294901760, %v1274_v30  ;;  %v1796_v46 = vand.u32 4294901760, %v1726_v44 }
 0x205   : > { %v820_v20 = vpop.permute.xlu0 %819  ;;  %v1345_v32 = vsub.f32 %v1274_v30, %v1344_v31  ;;  %v1797_v48 = vsub.f32 %v1726_v44, %v1796_v46 }
 0x206   : > { %v824_v21 = vsel %vm821_vm2, %v820_v20, 0  ;;  %1724 = vrot.lane.b32.xlu1 %v5893_v19, %s5552_s7 }
 0x207   : > { %v827_v23 = vand.u32 4294901760, %v824_v21  ;;  %v1346_v33 = vand.u32 4294901760, %v1345_v32  ;;  %v1798_v50 = vand.u32 4294901760, %v1797_v48 }
 0x209   : > { %v904_v24 = vsub.f32 %v824_v21, %v827_v23  ;;  %4922 = vmatpush3.xpose.msra.mxu1 %v827_v23  ;;  %v5897_v25 = vpop.permute.xlu0 %817  ;;  %v1347_v36 = vsub.f32 %v1345_v32, %v1346_v33  ;;  %v1799_v52 = vsub.f32 %v1797_v48, %v1798_v50 }
 0x20a   : > { %2176 = vrot.lane.b32.xlu0 %v5897_v25, %s5552_s7  ;;  %4926 = vmatprep.subr.mxu1 %v5549_v1  ;;  %v2178_v57 = vsel %vm821_vm2, %v5897_v25, 0 }
 0x20b   : > { %v905_v27 = vand.u32 4294901760, %v904_v24  ;;  %v1348_v39 = vand.u32 4294901760, %v1347_v36  ;;  %v1800_v54 = vand.u32 4294901760, %v1799_v52  ;;  %v2248_v59 = vand.u32 4294901760, %v2178_v57 }
 0x20c   : > { %4924 = vmatmul.mubr.f32.vlgmr.msra.gmra.mrb[0].mxu1 %v896_v26 }
 0x20d   : > { %v906_v28 = vsub.f32 %v904_v24, %v905_v27  ;;  %4928 = vmatprep.mubr.msk.f32.mxu1 %vm5548_vm0, %v5549_v1  ;;  %v2249_v61 = vsub.f32 %v2178_v57, %v2248_v59 }
 0x20f   : > { %v907_v29 = vand.u32 4294901760, %v906_v28  ;;  %v2250_v63 = vand.u32 4294901760, %v2249_v61 }
 0x211   : > { %4927 = vmatpush3.xpose.msra.mxu1 %v907_v29  ;;  %v2251_v3 = vsub.f32 %v2249_v61, %v2250_v63 }
 0x212   : > { %4931 = vmatprep.subr.mxu1 %v5549_v1 }
 0x213   : > { %v2252_v5 = vand.u32 4294901760, %v2251_v3 }
 0x214   : > { %4929 = vmatmul.mubr.f32.vlgmr.msra.gmra.mrb[0].mxu1 %v892_v15 }
 0x215   : > { %4932 = vmatpush3.xpose.msra.mxu1 %v904_v24  ;;  %4933 = vmatprep.mubr.msk.f32.mxu1 %vm5548_vm0, %v5549_v1 }
 0x216   : > { %4936 = vmatprep.subr.mxu1 %v5549_v1 }
 0x21c   : > { %4934 = vmatmul.mubr.f32.vlgmr.msra.gmra.mrb[0].mxu1 %v893_v16 }
 0x21d   : > { %4937 = vmatpush3.xpose.msra.mxu1 %v827_v23  ;;  %4938 = vmatprep.mubr.msk.f32.mxu1 %vm5548_vm0, %v5549_v1 }
 0x21e   : > { %4941 = vmatprep.subr.mxu1 %v5549_v1 }
 0x224   : > { %4939 = vmatmul.mubr.f32.vlgmr.msra.gmra.mrb[0].mxu1 %v894_v18 }
 0x225   : > { %4942 = vmatpush3.xpose.msra.mxu1 %v905_v27  ;;  %4943 = vmatprep.mubr.msk.f32.mxu1 %vm5548_vm0, %v5549_v1 }
 0x226   : > { %4946 = vmatprep.subr.mxu1 %v5549_v1 }
 0x22c   : > { %4944 = vmatmul.mubr.f32.vlgmr.msra.gmra.mrb[0].mxu1 %v892_v15 }
 0x22d   : > { %4947 = vmatpush3.xpose.msra.mxu1 %v827_v23  ;;  %4948 = vmatprep.mubr.msk.f32.mxu1 %vm5548_vm0, %v5549_v1 }
 0x22e   : > { %4951 = vmatprep.subr.mxu1 %v5549_v1 }
 0x234   : > { %4949 = vmatmul.mubr.f32.vlgmr.msra.gmra.mrb[0].mxu1 %v892_v15 }
 0x235   : > { %4953 = vmatprep.mubr.msk.f32.mxu1 %vm5548_vm0, %v5549_v1 }
 0x274   : > { %v1273_v34 = vpop.permute.xlu1 %1272 }
 0x275   : > { %v1276_v35 = vsel %vm821_vm2, %v1273_v34, 0 }
 0x276   : > { %v1279_v37 = vand.u32 4294901760, %v1276_v35 }
 0x278   : > { %v1356_v38 = vsub.f32 %v1276_v35, %v1279_v37  ;;  %4952 = vmatpush3.xpose.msra.mxu1 %v1279_v37  ;;  %v1725_v43 = vpop.permute.xlu1 %1724 }
 0x279   : > { %4956 = vmatprep.subr.mxu1 %v5549_v1  ;;  %v1728_v45 = vsel %vm821_vm2, %v1725_v43, 0 }
 0x27a   : > { %v1357_v40 = vand.u32 4294901760, %v1356_v38  ;;  %v1731_v47 = vand.u32 4294901760, %v1728_v45 }
 0x27b   : > { %4954 = vmatmul.mubr.f32.vlgmr.msra.gmra.mrb[2].mxu1 %v1348_v39 }
 0x27c   : > { %v1358_v41 = vsub.f32 %v1356_v38, %v1357_v40  ;;  %4958 = vmatprep.mubr.msk.f32.mxu1 %vm5548_vm0, %v5549_v1  ;;  %v1808_v49 = vsub.f32 %v1728_v45, %v1731_v47  ;;  %v2177_v56 = vpop.permute.xlu0 %2176 }
 0x27d   : > { %v2180_v58 = vsel %vm821_vm2, %v2177_v56, 0 }
 0x27e   : > { %v1359_v42 = vand.u32 4294901760, %v1358_v41  ;;  %v1809_v51 = vand.u32 4294901760, %v1808_v49  ;;  %v2183_v60 = vand.u32 4294901760, %v2180_v58 }
 0x280   : > { %4957 = vmatpush3.xpose.msra.mxu1 %v1359_v42  ;;  %v1810_v53 = vsub.f32 %v1808_v49, %v1809_v51  ;;  %v2260_v62 = vsub.f32 %v2180_v58, %v2183_v60 }
 0x281   : > { %4961 = vmatprep.subr.mxu1 %v5549_v1 }
 0x282   : > { %v1811_v55 = vand.u32 4294901760, %v1810_v53  ;;  %v2261_v2 = vand.u32 4294901760, %v2260_v62 }
 0x283   : > { %4959 = vmatmul.mubr.f32.vlgmr.msra.gmra.mrb[2].mxu1 %v1344_v31 }
 0x284   : > { %4962 = vmatpush3.xpose.msra.mxu1 %v1356_v38  ;;  %4963 = vmatprep.mubr.msk.f32.mxu1 %vm5548_vm0, %v5549_v1  ;;  %v2262_v4 = vsub.f32 %v2260_v62, %v2261_v2 }
 0x285   : > { %4966 = vmatprep.subr.mxu1 %v5549_v1 }
 0x286   : > { %v2263_v6 = vand.u32 4294901760, %v2262_v4 }
 0x28b   : > { %4964 = vmatmul.mubr.f32.vlgmr.msra.gmra.mrb[2].mxu1 %v1345_v32 }
 0x28c   : > { %4967 = vmatpush3.xpose.msra.mxu1 %v1279_v37  ;;  %4968 = vmatprep.mubr.msk.f32.mxu1 %vm5548_vm0, %v5549_v1 }
 0x28d   : > { %4971 = vmatprep.subr.mxu1 %v5549_v1 }
 0x293   : > { %4969 = vmatmul.mubr.f32.vlgmr.msra.gmra.mrb[2].mxu1 %v1346_v33 }
 0x294   : > { %4972 = vmatpush3.xpose.msra.mxu1 %v1357_v40  ;;  %4973 = vmatprep.mubr.msk.f32.mxu1 %vm5548_vm0, %v5549_v1 }
 0x295   : > { %4976 = vmatprep.subr.mxu1 %v5549_v1 }
 0x29b   : > { %4974 = vmatmul.mubr.f32.vlgmr.msra.gmra.mrb[2].mxu1 %v1344_v31 }
 0x29c   : > { %4977 = vmatpush3.xpose.msra.mxu1 %v1279_v37  ;;  %4978 = vmatprep.mubr.msk.f32.mxu1 %vm5548_vm0, %v5549_v1 }
 0x29d   : > { %4981 = vmatprep.subr.mxu1 %v5549_v1 }
 0x2a3   : > { %4979 = vmatmul.mubr.f32.vlgmr.msra.gmra.mrb[2].mxu1 %v1344_v31 }
 0x2a4   : > { %4982 = vmatpush3.xpose.msra.mxu1 %v1731_v47  ;;  %4983 = vmatprep.mubr.msk.f32.mxu1 %vm5548_vm0, %v5549_v1 }
 0x2a5   : > { %4986 = vmatprep.subr.mxu1 %v5549_v1 }
 0x2a7   : > { %4984 = vmatmul.mubr.f32.vlgmr.msra.gmra.mrb[4].mxu1 %v1800_v54 }
 0x2a8   : > { %4987 = vmatpush3.xpose.msra.mxu1 %v1811_v55  ;;  %4988 = vmatprep.mubr.msk.f32.mxu1 %vm5548_vm0, %v5549_v1 }
 0x2a9   : > { %4991 = vmatprep.subr.mxu1 %v5549_v1 }
 0x2af   : > { %4989 = vmatmul.mubr.f32.vlgmr.msra.gmra.mrb[4].mxu1 %v1796_v46 }
 0x2b0   : > { %4992 = vmatpush3.xpose.msra.mxu1 %v1808_v49  ;;  %4993 = vmatprep.mubr.msk.f32.mxu1 %vm5548_vm0, %v5549_v1 }
 0x2b1   : > { %4996 = vmatprep.subr.mxu1 %v5549_v1 }
 0x2b7   : > { %4994 = vmatmul.mubr.f32.vlgmr.msra.gmra.mrb[4].mxu1 %v1797_v48 }
 0x2b8   : > { %4997 = vmatpush3.xpose.msra.mxu1 %v1731_v47  ;;  %4998 = vmatprep.mubr.msk.f32.mxu1 %vm5548_vm0, %v5549_v1 }
 0x2b9   : > { %5001 = vmatprep.subr.mxu1 %v5549_v1 }
 0x2bf   : > { %4999 = vmatmul.mubr.f32.vlgmr.msra.gmra.mrb[4].mxu1 %v1798_v50 }
 0x2c0   : > { %5002 = vmatpush3.xpose.msra.mxu1 %v1809_v51  ;;  %5003 = vmatprep.mubr.msk.f32.mxu1 %vm5548_vm0, %v5549_v1 }
 0x2c1   : > { %5006 = vmatprep.subr.mxu1 %v5549_v1 }
 0x2c7   : > { %5004 = vmatmul.mubr.f32.vlgmr.msra.gmra.mrb[4].mxu1 %v1796_v46 }
 0x2c8   : > { %5007 = vmatpush3.xpose.msra.mxu1 %v1731_v47  ;;  %5008 = vmatprep.mubr.msk.f32.mxu1 %vm5548_vm0, %v5549_v1 }
 0x2c9   : > { %5011 = vmatprep.subr.mxu1 %v5549_v1 }
 0x2cf   : > { %5009 = vmatmul.mubr.f32.vlgmr.msra.gmra.mrb[4].mxu1 %v1796_v46 }
 0x2d0   : > { %5012 = vmatpush3.xpose.msra.mxu1 %v2183_v60  ;;  %5013 = vmatprep.mubr.msk.f32.mxu1 %vm5548_vm0, %v5549_v1 }
 0x2d1   : > { %5016 = vmatprep.subr.mxu1 %v5549_v1 }
 0x2d3   : > { %5014 = vmatmul.mubr.f32.vlgmr.msra.gmra.mrb[6].mxu1 %v2252_v5 }
 0x2d4   : > { %5017 = vmatpush3.xpose.msra.mxu1 %v2263_v6  ;;  %5018 = vmatprep.mubr.msk.f32.mxu1 %vm5548_vm0, %v5549_v1 }
 0x2d5   : > { %5021 = vmatprep.subr.mxu1 %v5549_v1 }
 0x2db   : > { %5019 = vmatmul.mubr.f32.vlgmr.msra.gmra.mrb[6].mxu1 %v2248_v59 }
 0x2dc   : > { %5022 = vmatpush3.xpose.msra.mxu1 %v2260_v62  ;;  %5023 = vmatprep.mubr.msk.f32.mxu1 %vm5548_vm0, %v5549_v1 }
 0x2dd   : > { %5026 = vmatprep.subr.mxu1 %v5549_v1 }
 0x2e3   : > { %5024 = vmatmul.mubr.f32.vlgmr.msra.gmra.mrb[6].mxu1 %v2249_v61 }
 0x2e4   : > { %5027 = vmatpush3.xpose.msra.mxu1 %v2183_v60  ;;  %5028 = vmatprep.mubr.msk.f32.mxu1 %vm5548_vm0, %v5549_v1 }
 0x2e5   : > { %5031 = vmatprep.subr.mxu1 %v5549_v1 }
 0x2eb   : > { %5029 = vmatmul.mubr.f32.vlgmr.msra.gmra.mrb[6].mxu1 %v2250_v63 }
 0x2ec   : > { %5032 = vmatpush3.xpose.msra.mxu1 %v2261_v2  ;;  %5033 = vmatprep.mubr.msk.f32.mxu1 %vm5548_vm0, %v5549_v1 }
 0x2ed   : > { %5036 = vmatprep.subr.mxu1 %v5549_v1 }
 0x2f3   : > { %5034 = vmatmul.mubr.f32.vlgmr.msra.gmra.mrb[6].mxu1 %v2248_v59 }
 0x2f4   : > { %5037 = vmatpush3.xpose.msra.mxu1 %v2183_v60  ;;  %5038 = vmatprep.mubr.msk.f32.mxu1 %vm5548_vm0, %v5549_v1 }
 0x2f5   : > { %5071 = vmatprep.subr.mxu1 %v5549_v1 }
 0x2fb   : > { %5039 = vmatmul.mubr.f32.vlgmr.msra.gmra.mrb[6].mxu1 %v2248_v59 }
 0x2fc   : > { %5073 = vmatprep.mubr.msk.f32.mxu1 %vm5548_vm0, %v5549_v1 }
 0x307   : > { %v1268_v7 = vpop.f32.mrb[0].mxu1 }
 0x308   : > { %v2628_v8 = vmul.f32 0.35355338, %v1268_v7  ;;  %v4950_v9 = vpop.f32.mrb[1].mxu1 }
 0x30a   : > { %v2632_v10 = vsel %vm821_vm2, %v2628_v8, -inf }
 0x30b   : > { %2633 = vmax.xlane.f32.xlu1 %v2632_v10 }
 0x376   : > { %v1720_v11 = vpop.f32.mrb[2].mxu1 }
 0x377   : > { %v2629_v12 = vmul.f32 0.35355338, %v1720_v11  ;;  %v4980_v14 = vpop.f32.mrb[3].mxu1 }
 0x379   : > { %v2635_v0 = vsel %vm821_vm2, %v2629_v12, -inf }
 0x37a   : > { %2636 = vmax.xlane.f32.xlu0 %v2635_v0 }
 0x398   : > { %v2634_v15 = vpop.xlane.xlu1 %2633 }
 0x399   : > { %v2644_v16 = vsub.f32 %v2628_v8, %v2634_v15 }
 0x39b   : > { %v2648_v18 = vmul.f32 1.442695, %v2644_v16 }
 0x39d   : > { %5394 = vpow2.f32 %v2648_v18 }
 0x3a2   : > { %v2172_v20 = vpop.f32.mrb[4].mxu1 }
 0x3a3   : > { %v2630_v21 = vmul.f32 0.35355338, %v2172_v20  ;;  %v5010_v22 = vpop.f32.mrb[5].mxu1 }
 0x3a5   : > { %v2638_v23 = vsel %vm821_vm2, %v2630_v21, -inf }
 0x3a6   : > { %2639 = vmax.xlane.f32.xlu0 %v2638_v23 }
 0x3a7   : > { %v5395_v24 = vpop.eup %5394 }
 0x3a8   : > { %v2656_v26 = vsel %vm821_vm2, %v5395_v24, 0.0 }
 0x3aa   : > { %2657 = vadd.xlane.f32.xlu0 %v2656_v26 }
 0x3c0   : > { %2676 = vrot.lane.b32.xlu0 %v5882_v13, %s5554_s11 }
 0x3ce   : > { %v2624_v27 = vpop.f32.mrb[6].mxu1 }
 0x3cf   : > { %v2631_v28 = vmul.f32 0.35355338, %v2624_v27  ;;  %v5040_v29 = vpop.f32.mrb[7].mxu1 }
 0x3d1   : > { %v2641_v30 = vsel %vm821_vm2, %v2631_v28, -inf }
 0x3d2   : > { %2642 = vmax.xlane.f32.xlu1 %v2641_v30 }
 0x407   : > { %v2637_v31 = vpop.xlane.xlu0 %2636 }
 0x408   : > { %v2645_v32 = vsub.f32 %v2629_v12, %v2637_v31 }
 0x40a   : > { %v2650_v33 = vmul.f32 1.442695, %v2645_v32 }
 0x40c   : > { %5396 = vpow2.f32 %v2650_v33 }
 0x416   : > { %v5988_v34 = vpop.eup %5396 }
 0x417   : > { %v2659_v35 = vsel %vm821_vm2, %v5988_v34, 0.0 }
 0x418   : > { %2660 = vadd.xlane.f32.xlu1 %v2659_v35 }
 0x429   : > { %3128 = vrot.lane.b32.xlu1 %v5890_v17, %s5554_s11 }
 0x433   : > { %v2640_v13 = vpop.xlane.xlu0 %2639 }
 0x434   : > { %v2646_v36 = vsub.f32 %v2630_v21, %v2640_v13 }
 0x436   : > { %v2652_v38 = vmul.f32 1.442695, %v2646_v36 }
 0x437   : > { %v2658_v37 = vpop.xlane.xlu0 %2657 }
 0x438   : > { %5398 = vrcp.f32 %v2658_v37 }
 0x439   : > { %5400 = vpow2.f32 %v2652_v38 }
 0x43b   : > { %v2677_v39 = vpop.permute.xlu0 %2676 }
 0x43c   : > { %v2683_v40 = vand.u32 4294901760, %v2677_v39 }
 0x43e   : > { %5042 = vmatpush3.msra.mxu0 %v2683_v40  ;;  %v2760_v43 = vsub.f32 %v2677_v39, %v2683_v40 }
 0x43f   : > { %5046 = vmatprep.subr.mxu0 %v5549_v1 }
 0x440   : > { %v2761_v46 = vand.u32 4294901760, %v2760_v43 }
 0x442   : > { %v5399_v41 = vpop.eup %5398  ;;  %v2762_v49 = vsub.f32 %v2760_v43, %v2761_v46 }
 0x443   : > { %v2669_v42 = vmul.f32 %v5399_v41, %v5395_v24  ;;  %v5996_v47 = vpop.eup %5400 }
 0x444   : > { %v2662_v50 = vsel %vm821_vm2, %v5996_v47, 0.0  ;;  %v2763_v53 = vand.u32 4294901760, %v2762_v49 }
 0x445   : > { %v2680_v44 = vsel %vm821_vm2, %v2669_v42, 0 }
 0x446   : > { %v2748_v45 = vand.u32 4294901760, %v2680_v44 }
 0x448   : > { %v2749_v17 = vsub.f32 %v2680_v44, %v2748_v45 }
 0x44a   : > { %v2750_v48 = vand.u32 4294901760, %v2749_v17 }
 0x44c   : > { %v2751_v51 = vsub.f32 %v2749_v17, %v2750_v48 }
 0x44d   : > { %2663 = vadd.xlane.f32.xlu1 %v2662_v50 }
 0x44e   : > { %v2752_v52 = vand.u32 4294901760, %v2751_v51 }
 0x450   : > { %5044 = vmatmul.mubr.f32.vlgmr.msra.gmra.mrb[2].mxu0 %v2752_v52 }
 0x451   : > { %5047 = vmatpush3.msra.mxu0 %v2763_v53  ;;  %5048 = vmatprep.mubr.msk.f32.mxu0 %vm5548_vm0, %v5549_v1 }
 0x452   : > { %5051 = vmatprep.subr.mxu0 %v5549_v1 }
 0x458   : > { %5049 = vmatmul.mubr.f32.vlgmr.msra.gmra.mrb[2].mxu0 %v2748_v45 }
 0x459   : > { %5052 = vmatpush3.msra.mxu0 %v2760_v43  ;;  %5053 = vmatprep.mubr.msk.f32.mxu0 %vm5548_vm0, %v5549_v1 }
 0x45a   : > { %5056 = vmatprep.subr.mxu0 %v5549_v1 }
 0x45e   : > { %4032 = vrot.lane.b32.xlu1 %v5897_v25, %s5554_s11 }
 0x45f   : > { %v2643_v54 = vpop.xlane.xlu1 %2642 }
 0x460   : > { %v2647_v55 = vsub.f32 %v2631_v28, %v2643_v54  ;;  %5054 = vmatmul.mubr.f32.vlgmr.msra.gmra.mrb[2].mxu0 %v2749_v17 }
 0x461   : > { %5057 = vmatpush3.msra.mxu0 %v2683_v40  ;;  %5058 = vmatprep.mubr.msk.f32.mxu0 %vm5548_vm0, %v5549_v1 }
 0x462   : > { %v2654_v56 = vmul.f32 1.442695, %v2647_v55  ;;  %5061 = vmatprep.subr.mxu0 %v5549_v1 }
 0x464   : > { %5402 = vpow2.f32 %v2654_v56 }
 0x468   : > { %5059 = vmatmul.mubr.f32.vlgmr.msra.gmra.mrb[2].mxu0 %v2750_v48 }
 0x469   : > { %5062 = vmatpush3.msra.mxu0 %v2761_v46  ;;  %5063 = vmatprep.mubr.msk.f32.mxu0 %vm5548_vm0, %v5549_v1 }
 0x46a   : > { %5066 = vmatprep.subr.mxu0 %v5549_v1 }
 0x46e   : > { %v6014_v57 = vpop.eup %5402 }
 0x46f   : > { %v2665_v25 = vsel %vm821_vm2, %v6014_v57, 0.0 }
 0x470   : > { %2666 = vadd.xlane.f32.xlu0 %v2665_v25  ;;  %5064 = vmatmul.mubr.f32.vlgmr.msra.gmra.mrb[2].mxu0 %v2748_v45  ;;  %v5412_v25 = vld [vmem:[%s5731_s27] sm:$0xff] }
 0x471   : > { %5067 = vmatpush3.msra.mxu0 %v2683_v40  ;;  %5068 = vmatprep.mubr.msk.f32.mxu0 %vm5548_vm0, %v5549_v1 }
 0x472   : > { %5101 = vmatprep.subr.mxu0 %v5549_v1 }
 0x478   : > { %5069 = vmatmul.mubr.f32.vlgmr.msra.gmra.mrb[2].mxu0 %v2748_v45 }
 0x479   : > { %5103 = vmatprep.mubr.msk.f32.mxu0 %vm5548_vm0, %v5549_v1 }
 0x486   : > { %3580 = vrot.lane.b32.xlu0 %v5893_v19, %s5554_s11  ;;  %s4547_s11 = scalar_lea.sflag [#allocation5], %s5725_s16 }
 0x4a5   : > { %v2661_v58 = vpop.xlane.xlu1 %2660 }
 0x4a6   : > { %5404 = vrcp.f32 %v2661_v58 }
 0x4a9   : > { %v3129_v59 = vpop.permute.xlu1 %3128 }
 0x4aa   : > { %v3135_v60 = vand.u32 4294901760, %v3129_v59 }
 0x4ac   : > { %5072 = vmatpush3.msra.mxu1 %v3135_v60  ;;  %v3212_v63 = vsub.f32 %v3129_v59, %v3135_v60 }
 0x4ad   : > { %5076 = vmatprep.subr.mxu1 %v5549_v1 }
 0x4ae   : > { %v3213_v4 = vand.u32 4294901760, %v3212_v63 }
 0x4b0   : > { %v5405_v61 = vpop.eup %5404  ;;  %v3214_v7 = vsub.f32 %v3212_v63, %v3213_v4 }
 0x4b1   : > { %v2671_v62 = vmul.f32 %v5405_v61, %v5988_v34 }
 0x4b2   : > { %v3215_v9 = vand.u32 4294901760, %v3214_v7  ;;  %v4651_v7 = vld [vmem:[%s6153_s3] ss:$0 sm:$0xff] }
 0x4b3   : > { %v3132_v2 = vsel %vm821_vm2, %v2671_v62, 0 }
 0x4b4   : > { %v3200_v3 = vand.u32 4294901760, %v3132_v2 }
 0x4b6   : > { %v3201_v5 = vsub.f32 %v3132_v2, %v3200_v3 }
 0x4b8   : > { %v3202_v6 = vand.u32 4294901760, %v3201_v5 }
 0x4ba   : > { %v3203_v8 = vsub.f32 %v3201_v5, %v3202_v6 }
 0x4bc   : > { %v3204_v19 = vand.u32 4294901760, %v3203_v8 }
 0x4be   : > { %5074 = vmatmul.mubr.f32.vlgmr.msra.gmra.mrb[8].mxu1 %v3204_v19  ;;  %v4652_v19 = vld [vmem:[%s6154_s4] ss:$0 sm:$0xff] }
 0x4bf   : > { %5077 = vmatpush3.msra.mxu1 %v3215_v9  ;;  %5078 = vmatprep.mubr.msk.f32.mxu1 %vm5548_vm0, %v5549_v1 }
 0x4c0   : > { %5081 = vmatprep.subr.mxu1 %v5549_v1 }
 0x4c6   : > { %5079 = vmatmul.mubr.f32.vlgmr.msra.gmra.mrb[8].mxu1 %v3200_v3 }
 0x4c7   : > { %5082 = vmatpush3.msra.mxu1 %v3212_v63  ;;  %5083 = vmatprep.mubr.msk.f32.mxu1 %vm5548_vm0, %v5549_v1 }
 0x4c8   : > { %5086 = vmatprep.subr.mxu1 %v5549_v1 }
 0x4ce   : > { %5084 = vmatmul.mubr.f32.vlgmr.msra.gmra.mrb[8].mxu1 %v3201_v5 }
 0x4cf   : > { %5087 = vmatpush3.msra.mxu1 %v3135_v60  ;;  %5088 = vmatprep.mubr.msk.f32.mxu1 %vm5548_vm0, %v5549_v1 }
 0x4d0   : > { %5091 = vmatprep.subr.mxu1 %v5549_v1 }
 0x4d6   : > { %5089 = vmatmul.mubr.f32.vlgmr.msra.gmra.mrb[8].mxu1 %v3202_v6 }
 0x4d7   : > { %5092 = vmatpush3.msra.mxu1 %v3213_v4  ;;  %5093 = vmatprep.mubr.msk.f32.mxu1 %vm5548_vm0, %v5549_v1 }
 0x4d8   : > { %5096 = vmatprep.subr.mxu1 %v5549_v1 }
 0x4da   : > { %v2664_v10 = vpop.xlane.xlu1 %2663 }
 0x4db   : > { %5406 = vrcp.f32 %v2664_v10 }
 0x4de   : > { %5094 = vmatmul.mubr.f32.vlgmr.msra.gmra.mrb[8].mxu1 %v3200_v3  ;;  %v4033_v11 = vpop.permute.xlu1 %4032 }
 0x4df   : > { %5097 = vmatpush3.msra.mxu1 %v3135_v60  ;;  %5098 = vmatprep.mubr.msk.f32.mxu1 %vm5548_vm0, %v5549_v1  ;;  %v6043_v12 = vand.u32 4294901760, %v4033_v11 }
 0x4e0   : > { %5131 = vmatprep.subr.mxu1 %v5549_v1 }
 0x4e1   : > { %v4116_v31 = vsub.f32 %v4033_v11, %v6043_v12 }
 0x4e3   : > { %v4117_v13 = vand.u32 4294901760, %v4116_v31 }
 0x4e5   : > { %v5407_v14 = vpop.eup %5406  ;;  %v4118_v38 = vsub.f32 %v4116_v31, %v4117_v13 }
 0x4e6   : > { %5099 = vmatmul.mubr.f32.vlgmr.msra.gmra.mrb[8].mxu1 %v3200_v3  ;;  %v2673_v0 = vmul.f32 %v5407_v14, %v5996_v47 }
 0x4e7   : > { %5132 = vmatpush3.msra.mxu1 %v6043_v12  ;;  %5133 = vmatprep.mubr.msk.f32.mxu1 %vm5548_vm0, %v5549_v1  ;;  %v4119_v41 = vand.u32 4294901760, %v4118_v38 }
 0x4e8   : > { %5136 = vmatprep.subr.mxu1 %v5549_v1  ;;  %v3584_v15 = vsel %vm821_vm2, %v2673_v0, 0 }
 0x4e9   : > { %v3652_v16 = vand.u32 4294901760, %v3584_v15 }
 0x4eb   : > { %v3653_v18 = vsub.f32 %v3584_v15, %v3652_v16 }
 0x4ed   : > { %v3654_v20 = vand.u32 4294901760, %v3653_v18 }
 0x4ef   : > { %v3655_v22 = vsub.f32 %v3653_v18, %v3654_v20 }
 0x4f1   : > { %v3656_v26 = vand.u32 4294901760, %v3655_v22 }
 0x4fd   : > { %v2667_v21 = vpop.xlane.xlu0 %2666 }
 0x4fe   : > { %5408 = vrcp.f32 %v2667_v21 }
 0x501   : > { %v3581_v23 = vpop.permute.xlu0 %3580 }
 0x502   : > { %v3587_v24 = vand.u32 4294901760, %v3581_v23 }
 0x504   : > { %v3664_v27 = vsub.f32 %v3581_v23, %v3587_v24  ;;  %5102 = vmatpush3.msra.mxu0 %v3587_v24 }
 0x505   : > { %5104 = vmatmul.mubr.f32.vlgmr.msra.gmra.mrb[4].mxu0 %v3656_v26  ;;  %5106 = vmatprep.subr.mxu0 %v5549_v1 }
 0x506   : > { %v3665_v28 = vand.u32 4294901760, %v3664_v27  ;;  %5108 = vmatprep.mubr.msk.f32.mxu0 %vm5548_vm0, %v5549_v1 }
 0x508   : > { %v5409_v29 = vpop.eup %5408  ;;  %v3666_v30 = vsub.f32 %v3664_v27, %v3665_v28 }
 0x509   : > { %v2675_v32 = vmul.f32 %v5409_v29, %v6014_v57 }
 0x50a   : > { %v3667_v33 = vand.u32 4294901760, %v3666_v30 }
 0x50b   : > { %v4036_v34 = vsel %vm821_vm2, %v2675_v32, 0 }
 0x50c   : > { %5107 = vmatpush3.msra.mxu0 %v3667_v33  ;;  %v4104_v35 = vand.u32 4294901760, %v4036_v34 }
 0x50d   : > { %5109 = vmatmul.mubr.f32.vlgmr.msra.gmra.mrb[4].mxu0 %v3652_v16  ;;  %5111 = vmatprep.subr.mxu0 %v5549_v1 }
 0x50e   : > { %5112 = vmatpush3.msra.mxu0 %v3664_v27  ;;  %5113 = vmatprep.mubr.msk.f32.mxu0 %vm5548_vm0, %v5549_v1  ;;  %v4105_v36 = vsub.f32 %v4036_v34, %v4104_v35 }
 0x50f   : > { %5116 = vmatprep.subr.mxu0 %v5549_v1 }
 0x510   : > { %v4106_v37 = vand.u32 4294901760, %v4105_v36 }
 0x512   : > { %v4107_v39 = vsub.f32 %v4105_v36, %v4106_v37 }
 0x514   : > { %v4108_v40 = vand.u32 4294901760, %v4107_v39 }
 0x515   : > { %5114 = vmatmul.mubr.f32.vlgmr.msra.gmra.mrb[4].mxu0 %v3653_v18 }
 0x516   : > { %5117 = vmatpush3.msra.mxu0 %v3587_v24  ;;  %5134 = vmatmul.mubr.f32.vlgmr.msra.gmra.mrb[10].mxu1 %v4108_v40 }
 0x517   : > { %5137 = vmatpush3.msra.mxu1 %v4119_v41  ;;  %5118 = vmatprep.mubr.msk.f32.mxu0 %vm5548_vm0, %v5549_v1 }
 0x518   : > { %5121 = vmatprep.subr.mxu0 %v5549_v1  ;;  %5138 = vmatprep.mubr.msk.f32.mxu1 %vm5548_vm0, %v5549_v1 }
 0x519   : > { %5141 = vmatprep.subr.mxu1 %v5549_v1 }
 0x51d   : > { %5119 = vmatmul.mubr.f32.vlgmr.msra.gmra.mrb[4].mxu0 %v3654_v20 }
 0x51e   : > { %5122 = vmatpush3.msra.mxu0 %v3665_v28  ;;  %5139 = vmatmul.mubr.f32.vlgmr.msra.gmra.mrb[10].mxu1 %v4104_v35 }
 0x51f   : > { %5142 = vmatpush3.msra.mxu1 %v4116_v31  ;;  %5123 = vmatprep.mubr.msk.f32.mxu0 %vm5548_vm0, %v5549_v1 }
 0x520   : > { %5126 = vmatprep.subr.mxu0 %v5549_v1  ;;  %5143 = vmatprep.mubr.msk.f32.mxu1 %vm5548_vm0, %v5549_v1 }
 0x521   : > { %5146 = vmatprep.subr.mxu1 %v5549_v1 }
 0x525   : > { %5124 = vmatmul.mubr.f32.vlgmr.msra.gmra.mrb[4].mxu0 %v3652_v16 }
 0x526   : > { %5127 = vmatpush3.msra.mxu0 %v3587_v24  ;;  %5144 = vmatmul.mubr.f32.vlgmr.msra.gmra.mrb[10].mxu1 %v4105_v36 }
 0x527   : > { %5147 = vmatpush3.msra.mxu1 %v6043_v12  ;;  %5128 = vmatprep.mubr.msk.f32.mxu0 %vm5548_vm0, %v5549_v1 }
 0x528   : > { %5148 = vmatprep.mubr.msk.f32.mxu1 %vm5548_vm0, %v5549_v1  ;;  %5151 = vmatprep.subr.mxu1 %v5549_v1 }
 0x52d   : > { %5129 = vmatmul.mubr.f32.vlgmr.msra.gmra.mrb[4].mxu0 %v3652_v16 }
 0x52e   : > { %5149 = vmatmul.mubr.f32.vlgmr.msra.gmra.mrb[10].mxu1 %v4106_v37 }
 0x52f   : > { %5152 = vmatpush3.msra.mxu1 %v4117_v13  ;;  %5153 = vmatprep.mubr.msk.f32.mxu1 %vm5548_vm0, %v5549_v1 }
 0x530   : > { %5156 = vmatprep.subr.mxu1 %v5549_v1 }
 0x536   : > { %5154 = vmatmul.mubr.f32.vlgmr.msra.gmra.mrb[10].mxu1 %v4104_v35 }
 0x537   : > { %5157 = vmatpush3.msra.mxu1 %v6043_v12  ;;  %5158 = vmatprep.mubr.msk.f32.mxu1 %vm5548_vm0, %v5549_v1 }
 0x53e   : > { %5159 = vmatmul.mubr.f32.vlgmr.msra.gmra.mrb[10].mxu1 %v4104_v35 }
 0x54b   : > { %v3124_v42 = vpop.f32.mrb[2].mxu0 }
 0x54c   : > { %4484 = vst.msk [vmem:[#allocation2] sm:$0xff] %vm821_vm2, %v3124_v42  ;;  %v5070_v43 = vpop.f32.mrb[3].mxu0 }
 0x5b9   : > { %v3576_v44 = vpop.f32.mrb[8].mxu1 }
 0x5ba   : > { %4485 = vst.msk [vmem:[#allocation2 + $0x8] sm:$0xff] %vm821_vm2, %v3576_v44  ;;  %v5100_v45 = vpop.f32.mrb[9].mxu1 }
 0x600   : > { %v4028_v46 = vpop.f32.mrb[4].mxu0 }
 0x601   : > { %4486 = vst.msk [vmem:[#allocation2 + $0x10] sm:$0xff] %vm821_vm2, %v4028_v46  ;;  %v5130_v47 = vpop.f32.mrb[5].mxu0 }
 0x611   : > { %v4480_v17 = vpop.f32.mrb[10].mxu1 }
 0x612   : > { %4487 = vst.msk [vmem:[#allocation2 + $0x18] sm:$0xff] %vm821_vm2, %v4480_v17  ;;  %v5160_v48 = vpop.f32.mrb[11].mxu1 }
 0x619   : > { %v4492_v49 = vld [vmem:[#allocation2 + $0x2] ss:$4 sm:$0xff]  ;;  %v4490_v50 = vld [vmem:[#allocation2 + $0x1] ss:$4 sm:$0xff]  ;;  %v4494_v1 = vld [vmem:[#allocation2 + $0x3] ss:$4 sm:$0xff] }
 0x61a   : > { %4500 = vrot.lane.b32.xlu0 %v4492_v49, %s5555_s12  ;;  %4496 = vrot.lane.b32.xlu1 %v4490_v50, %s5556_s10  ;;  %v4488_v52 = vld [vmem:[#allocation2] ss:$4 sm:$0xff]  ;;  %s5471_s12 = scalar_lea.vmem %s6107_s14, 128  ;;  %s5477_s10 = scalar_lea.vmem %s5476_s17, 256 }
 0x61b   : > { %p5472_p4 = scmp.ne.s32.totalorder %s6107_s14, %s5471_s12  ;;  %p5479_p13 = scmp.lt.s32.totalorder %s5477_s10, %s5471_s12 }
 0x61d   : > { %p5473_p6 = pnand %p5472_p4, %p5680_p12  ;;  %p5480_p3 = por %p5479_p13, %p5478_p10 }
 0x61e   : > { %4504 = vrot.lane.b32.xlu1 %v4494_v1, %s5557_s29 }
 0x61f   : > { %p5474_p8 = pneg %p5473_p6 }
 0x621   : > { %p5481_p7 = pnand %p5480_p3, %p5474_p8 }
 0x68c   : > { %v4497_v51 = vpop.permute.xlu1 %4496  ;;  %v4501_v53 = vpop.permute.xlu0 %4500 }
 0x68d   : > { %v4507_v54 = vsel %vm821_vm2, %v4488_v52, %v4497_v51 }
 0x68e   : > { %v4509_v56 = vsel %vm4508_vm3, %v4507_v54, %v4501_v53 }
 0x690   : > { %v4505_v55 = vpop.permute.xlu1 %4504 }
 0x691   : > { %v4511_v57 = vsel %vm4510_vm4, %v4509_v56, %v4505_v55 }
 0x692   : > { %v4513_v58 = vadd.f32 %v5412_v25, %v4511_v57 }
 0x694   : > { %v4515_v59 = vsel %vm4514_vm5, %v4513_v58, 0.0 }
 0x695   : > { %4516 = vadd.xlane.f32.xlu0 %v4515_v59 }
 0x722   : > { %v4517_v60 = vpop.xlane.xlu0 %4516 }
 0x723   : > { %v4519_v61 = vmul.f32 0.03125, %v4517_v60 }
 0x725   : > { %v4520_v62 = vsub.f32 %v4513_v58, %v4519_v61 }
 0x727   : > { %v4521_v63 = vmul.f32 %v4520_v62, %v4520_v62 }
 0x729   : > { %v4522_v2 = vsel %vm4514_vm5, %v4521_v63, 0.0 }
 0x72a   : > { %4523 = vadd.xlane.f32.xlu1 %v4522_v2 }
 0x7b7   : > { %v4524_v3 = vpop.xlane.xlu1 %4523 }
 0x7b8   : > { %v4525_v4 = vmul.f32 0.03125, %v4524_v3 }
 0x7ba   : > { %v4526_v5 = vadd.f32 1e-05, %v4525_v4 }
 0x7bc   : > { %5410 = vrsqrt.f32 %v4526_v5 }
 0x7c6   : > { %v5411_v6 = vpop.eup %5410 }
 0x7c7   : > { %v4528_v8 = vmul.f32 %v5411_v6, %v4520_v62 }
 0x7c9   : > { %v4536_v9 = vmul.f32 %v4651_v7, %v4528_v8 }
 0x7cb   : > { %v4544_v10 = vadd.f32 %v4652_v19, %v4536_v9 }
 0x7cd   : > { %4545 = vst.msk [vmem:[%s254_s26] sm:$0xff] %vm4514_vm5, %v4544_v10 }
 0x7ce   : > { %5484 = shalt.err (!%p5481_p7)
}
 0x7cf   : > { %s5485_s16 = scalar_lea.hbm %s6105_s15, 128  ;;  %s5489_s28 = scalar_lea.hbm %s6155_s5, 256 }
 0x7d0   : > { %p5486_p9 = scmp.ne.s32.totalorder %s6105_s15, %s5485_s16  ;;  %p5490_p0 = scmp.lt.u32.totalorder %s6105_s15, %s6155_s5 }
 0x7d1   : > { %p5491_p11 = scmp.lt.u32.totalorder %s5489_s28, %s5485_s16  ;;  %p5493_p4 = scmp.lt.u32.totalorder %s5485_s16, %s6105_s15 }
 0x7d2   : > { %p5487_p2 = pnand %p5486_p9, %p5680_p12 }
 0x7d3   : > { %p5492_p1 = por %p5491_p11, %p5490_p0 }
 0x7d4   : > { %p5488_p5 = pneg %p5487_p2 }
 0x7d5   : > { %p5494_p6 = por %p5493_p4, %p5492_p1 }
 0x7d7   : > { %p5495_p8 = pnand %p5494_p6, %p5488_p5 }
 0x7d9   : > { %5498 = shalt.err (!%p5495_p8)
}
 0x7da   : > { %5330 = dma.vmem_to_hbm [thread:$0]  (%p5680_p12), %s6107_s14, 128, %s6105_s15, %s4547_s11  }
 0x7db PF: > { %s4572_s24 = sand.u32 1, %s5529_s18   ;;  %p6170_p10 = scmp.ne.s32.totalorder %s6160_s25, 0 }
 0x7dc   : > { %p6171_p13 = scmp.ge.s32.totalorder %s5541_s21, 2  ;;  %s4573_s26 = scalar_lea.sflag [#allocation5], %s4572_s24 }
 0x7de   : > { %p5341_p3 = pnand %p6171_p13, %p6170_p10 }
 0x7e0   : > { %5524 = dma.done.wait (!%p5341_p3), %s4573_s26, 128  }
 0x7e1   : > { %5526 = vsyncadd (!%p5341_p3), %s4573_s26, 4294967168  ;;  %p19_p7 = scmp.ge.s32.totalorder %s5645_s30, 4   ;;  %s6172_s18 = smov %s5533_s19 }
 0x7e2   : > { %s6173_s19 = smov %s5537_s20  ;;  %s6174_s20 = smov %s5676_s8 }
 0x7e3   : > { %s6175_s21 = smov %s5645_s30  ;;  %21 = sbr.rel (!%p19_p7) target bundleno = 6 (0x6), region = 92 }
 0x7ea   :  { %4578 = vsyncpa [#allocation4], 1 }
 0x7eb   :  { %4580 = vsyncpa [#allocation4 + $0x1], 1 }
 0x7ec   :  { %4581 = vsyncpa [#allocation7], 1 }
 0x7ed   :  { %4582 = vsyncpa [#allocation5], 1 }
 0x7ee   :  { %4584 = vsyncpa [#allocation5 + $0x1], 1 }

</bundles_post_ra>
